<compile_context>
chip_gen: v7x
topology: tpu7x:2x2x1
jax: 0.10.0
libtpu: 0.0.40
codegen_flags: <defaults>
</compile_context>

<pallas_src>
import functools

import jax
import jax.numpy as jnp
from jax.experimental import pallas as pl
from jax.experimental.pallas import tpu as pltpu


def _round_up(n: int, m: int) -> int:
    return ((n + m - 1) // m) * m


def _meta_loss_kernel(s_ref, g_ref, w1s_ref, w1g_ref, b1_ref, w2_ref, b2_ref, o_ref):
    # s_ref  : (bm, state_dim)        VMEM
    # g_ref  : (bm, goal_dim)         VMEM
    # w1s_ref: (state_dim, hidden_p)  VMEM (resident)
    # w1g_ref: (goal_dim,  hidden_p)  VMEM (resident)
    # b1_ref : (1, hidden_p)          VMEM (f32)
    # w2_ref : (hidden_p, n_pad)      VMEM (resident)
    # b2_ref : (1, n_pad)             VMEM (f32)
    # o_ref  : (bm, n_pad)            VMEM (lane-dense output)

    # Layer 1: fused "concat" matmul (two MXU passes, f32 accumulate) + ReLU.
    h = (
        jnp.dot(s_ref[...], w1s_ref[...], preferred_element_type=jnp.float32)
        + jnp.dot(g_ref[...], w1g_ref[...], preferred_element_type=jnp.float32)
        + b1_ref[...]
    )
    h = jnp.maximum(h, 0.0)

    # Layer 2: Linear (cast h back to the weight dtype so bf16 weights hit the
    # MXU natively; accumulation stays f32).
    y = (
        jnp.dot(h.astype(w2_ref.dtype), w2_ref[...], preferred_element_type=jnp.float32)
        + b2_ref[...]
    )

    # Softplus (matches torch.nn.Softplus: beta=1, threshold=20), f32 epilogue.
    y_clamped = jnp.minimum(y, 20.0)
    sp = jnp.where(y > 20.0, y, jnp.log1p(jnp.exp(y_clamped)))
    o_ref[...] = sp.astype(o_ref.dtype)


@functools.partial(jax.jit, static_argnames=("block_b", "matmul_dtype"))
def meta_loss_net_forward(state, goal, w1, b1, w2, b2, *, block_b=512, matmul_dtype=None):
    """Pallas forward pass of MetaLossNet. Returns (B, n_losses) positive weights.

    w1: (state_dim + goal_dim, hidden), b1: (hidden,)
    w2: (hidden, n_losses),             b2: (n_losses,)
    matmul_dtype: optional dtype (e.g. jnp.bfloat16) for MXU inputs on v6e/v7x.
    """
    B, state_dim = state.shape
    _, goal_dim = goal.shape
    in_dim, hidden = w1.shape
    _, n_losses = w2.shape
    assert in_dim == state_dim + goal_dim

    out_dtype = state.dtype

    # Lane-dense padded dims.
    hidden_pad = _round_up(hidden, 128)
    n_pad = _round_up(n_losses, 128)

    # Split W1 so the concatenated activation never exists in HBM.
    w1_s = w1[:state_dim, :]
    w1_g = w1[state_dim:, :]

    # Zero-pad hidden (N of matmul 1 / K of matmul 2) and n_losses (N of matmul 2).
    dh = hidden_pad - hidden
    dn = n_pad - n_losses
    if dh:
        w1_s = jnp.pad(w1_s, ((0, 0), (0, dh)))
        w1_g = jnp.pad(w1_g, ((0, 0), (0, dh)))
        b1 = jnp.pad(b1, ((0, dh),))
        w2 = jnp.pad(w2, ((0, dh), (0, 0)))
    if dn:
        w2 = jnp.pad(w2, ((0, 0), (0, dn)))
        b2 = jnp.pad(b2, ((0, dn),))

    # Optional mixed precision for the MXU inputs (v6e/v7x); biases/epilogue stay f32.
    if matmul_dtype is not None:
        state = state.astype(matmul_dtype)
        goal = goal.astype(matmul_dtype)
        w1_s = w1_s.astype(matmul_dtype)
        w1_g = w1_g.astype(matmul_dtype)
        w2 = w2.astype(matmul_dtype)

    b1_2d = b1.reshape(1, hidden_pad).astype(jnp.float32)
    b2_2d = b2.reshape(1, n_pad).astype(jnp.float32)

    # Large batch tiles (amortize ~0.35 us/step); clamp to B for small inputs.
    bm = min(block_b, B)
    grid = (pl.cdiv(B, bm),)

    out_padded = pl.pallas_call(
        _meta_loss_kernel,
        out_shape=jax.ShapeDtypeStruct((B, n_pad), out_dtype),
        grid_spec=pltpu.PrefetchScalarGridSpec(
            num_scalar_prefetch=0,
            grid=grid,
            in_specs=[
                pl.BlockSpec((bm, state_dim), lambda i: (i, 0)),          # state tile
                pl.BlockSpec((bm, goal_dim), lambda i: (i, 0)),           # goal tile
                pl.BlockSpec((state_dim, hidden_pad), lambda i: (0, 0)),  # W1[:state_dim]
                pl.BlockSpec((goal_dim, hidden_pad), lambda i: (0, 0)),   # W1[state_dim:]
                pl.BlockSpec((1, hidden_pad), lambda i: (0, 0)),          # b1
                pl.BlockSpec((hidden_pad, n_pad), lambda i: (0, 0)),      # W2
                pl.BlockSpec((1, n_pad), lambda i: (0, 0)),               # b2
            ],
            out_specs=pl.BlockSpec((bm, n_pad), lambda i: (i, 0)),        # lane-dense out
        ),
        compiler_params=pltpu.CompilerParams(
            dimension_semantics=("parallel",),
            vmem_limit_bytes=64 << 20,
        ),
    )(state, goal, w1_s, w1_g, b1_2d, w2, b2_2d)

    # Strip the lane padding back to the true n_losses.
    return out_padded[:, :n_losses]


def init_params(key, in_dim, hidden, n_losses, dtype=jnp.float32):
    """Deterministic synthetic init (PyTorch-style uniform fan-in bounds)."""
    k1, k2, k3, k4 = jax.random.split(key, 4)
    bound1 = 1.0 / jnp.sqrt(in_dim)
    bound2 = 1.0 / jnp.sqrt(hidden)
    w1 = jax.random.uniform(k1, (in_dim, hidden), dtype, -bound1, bound1)
    b1 = jax.random.uniform(k2, (hidden,), dtype, -bound1, bound1)
    w2 = jax.random.uniform(k3, (hidden, n_losses), dtype, -bound2, bound2)
    b2 = jax.random.uniform(k4, (n_losses,), dtype, -bound2, bound2)
    return w1, b1, w2, b2


if __name__ == "__main__":
    # Small shapes consistent with the module: in_dim = state_dim + goal_dim.
    batch = 16
    state_dim = 256
    goal_dim = 16
    in_dim = state_dim + goal_dim
    hidden = 64          # padded to 128 inside the wrapper
    n_losses = 10        # padded to 128 inside the wrapper

    key = jax.random.PRNGKey(0)
    k_state, k_goal, k_params = jax.random.split(key, 3)

    state = jax.random.normal(k_state, (batch, state_dim), dtype=jnp.float32)
    goal = jax.random.normal(k_goal, (batch, goal_dim), dtype=jnp.float32)
    w1, b1, w2, b2 = init_params(k_params, in_dim, hidden, n_losses)

    # f32 matmul inputs for an exact-tolerance check; pass
    # matmul_dtype=jnp.bfloat16 on v6e/v7x for the bandwidth-bound fast path.
    out = meta_loss_net_forward(state, goal, w1, b1, w2, b2)
    out = jax.block_until_ready(out)

    # Pure-JAX reference of the same math (with the concat).
    x = jnp.concatenate([state, goal], axis=-1)
    h = jnp.maximum(x @ w1 + b1, 0.0)
    y = h @ w2 + b2
    ref = jnp.where(y > 20.0, y, jnp.log1p(jnp.exp(jnp.minimum(y, 20.0))))

    assert out.shape == (batch, n_losses)
    assert bool(jnp.all(out > 0.0))
    assert bool(jnp.allclose(out, ref, atol=1e-5, rtol=1e-5))

    print("KERNEL_OK")
</pallas_src>

<mosaic_0001>
module attributes {stable_mosaic.version = 11 : i64} {
  func.func @_meta_loss_kernel(%arg0: i32, %arg1: memref<16x256xf32, #tpu.memory_space<vmem>>, %arg2: memref<16x16xf32, #tpu.memory_space<vmem>>, %arg3: memref<256x128xf32, #tpu.memory_space<vmem>>, %arg4: memref<16x128xf32, #tpu.memory_space<vmem>>, %arg5: memref<1x128xf32, #tpu.memory_space<vmem>>, %arg6: memref<128x128xf32, #tpu.memory_space<vmem>>, %arg7: memref<1x128xf32, #tpu.memory_space<vmem>>, %arg8: memref<16x128xf32, #tpu.memory_space<vmem>>) attributes {dimension_semantics = [#tpu.dimension_semantics<parallel>], iteration_bounds = array<i64: 1>, scalar_prefetch = 0 : i64, scratch_operands = 0 : i64, tpu.core_type = #tpu.core_type<tc>, window_params = [{transform_indices = @transform_0, window_bounds = array<i64: 16, 256>}, {transform_indices = @transform_1, window_bounds = array<i64: 16, 16>}, {pipeline_mode = #tpu.pipeline_mode<synchronous>, transform_indices = @transform_2, window_bounds = array<i64: 256, 128>}, {pipeline_mode = #tpu.pipeline_mode<synchronous>, transform_indices = @transform_3, window_bounds = array<i64: 16, 128>}, {pipeline_mode = #tpu.pipeline_mode<synchronous>, transform_indices = @transform_4, window_bounds = array<i64: 1, 128>}, {pipeline_mode = #tpu.pipeline_mode<synchronous>, transform_indices = @transform_5, window_bounds = array<i64: 128, 128>}, {pipeline_mode = #tpu.pipeline_mode<synchronous>, transform_indices = @transform_6, window_bounds = array<i64: 1, 128>}, {transform_indices = @transform_7, window_bounds = array<i64: 16, 128>}]} {
    %c0 = arith.constant 0 : index
    %c0_0 = arith.constant 0 : index
    %0 = vector.load %arg1[%c0, %c0_0] : memref<16x256xf32, #tpu.memory_space<vmem>>, vector<16x256xf32>
    %c0_1 = arith.constant 0 : index
    %c0_2 = arith.constant 0 : index
    %1 = vector.load %arg3[%c0_1, %c0_2] : memref<256x128xf32, #tpu.memory_space<vmem>>, vector<256x128xf32>
    %cst = arith.constant dense<0.000000e+00> : vector<16x128xf32>
    %2 = tpu.matmul %0, %1, %cst {dimension_numbers = #tpu.dot_dimension_numbers<[1], [0], [0], [1], [0, 0, 1, 1], [], []>} : vector<16x256xf32>, vector<256x128xf32>, vector<16x128xf32> -> vector<16x128xf32>
    %c0_3 = arith.constant 0 : index
    %c0_4 = arith.constant 0 : index
    %3 = vector.load %arg2[%c0_3, %c0_4] : memref<16x16xf32, #tpu.memory_space<vmem>>, vector<16x16xf32>
    %c0_5 = arith.constant 0 : index
    %c0_6 = arith.constant 0 : index
    %4 = vector.load %arg4[%c0_5, %c0_6] : memref<16x128xf32, #tpu.memory_space<vmem>>, vector<16x128xf32>
    %cst_7 = arith.constant dense<0.000000e+00> : vector<16x128xf32>
    %5 = tpu.matmul %3, %4, %cst_7 {dimension_numbers = #tpu.dot_dimension_numbers<[1], [0], [0], [1], [0, 0, 1, 1], [], []>} : vector<16x16xf32>, vector<16x128xf32>, vector<16x128xf32> -> vector<16x128xf32>
    %6 = arith.addf %2, %5 : vector<16x128xf32>
    %c0_8 = arith.constant 0 : index
    %c0_9 = arith.constant 0 : index
    %7 = vector.load %arg5[%c0_8, %c0_9] : memref<1x128xf32, #tpu.memory_space<vmem>>, vector<1x128xf32>
    %8 = vector.broadcast %7 : vector<1x128xf32> to vector<16x128xf32>
    %9 = arith.addf %6, %8 : vector<16x128xf32>
    %cst_10 = arith.constant 0.000000e+00 : f32
    %10 = vector.broadcast %cst_10 : f32 to vector<16x128xf32>
    %11 = arith.maximumf %9, %10 : vector<16x128xf32>
    %c0_11 = arith.constant 0 : index
    %c0_12 = arith.constant 0 : index
    %12 = vector.load %arg6[%c0_11, %c0_12] : memref<128x128xf32, #tpu.memory_space<vmem>>, vector<128x128xf32>
    %cst_13 = arith.constant dense<0.000000e+00> : vector<16x128xf32>
    %13 = tpu.matmul %11, %12, %cst_13 {dimension_numbers = #tpu.dot_dimension_numbers<[1], [0], [0], [1], [0, 0, 1, 1], [], []>} : vector<16x128xf32>, vector<128x128xf32>, vector<16x128xf32> -> vector<16x128xf32>
    %c0_14 = arith.constant 0 : index
    %c0_15 = arith.constant 0 : index
    %14 = vector.load %arg7[%c0_14, %c0_15] : memref<1x128xf32, #tpu.memory_space<vmem>>, vector<1x128xf32>
    %15 = vector.broadcast %14 : vector<1x128xf32> to vector<16x128xf32>
    %16 = arith.addf %13, %15 : vector<16x128xf32>
    %cst_16 = arith.constant 2.000000e+01 : f32
    %17 = vector.broadcast %cst_16 : f32 to vector<16x128xf32>
    %18 = arith.minimumf %16, %17 : vector<16x128xf32>
    %cst_17 = arith.constant 2.000000e+01 : f32
    %19 = vector.broadcast %cst_17 : f32 to vector<16x128xf32>
    %20 = arith.cmpf ogt, %16, %19 : vector<16x128xf32>
    %21 = math.exp %18 : vector<16x128xf32>
    %22 = math.log1p %21 : vector<16x128xf32>
    %23 = arith.select %20, %16, %22 : vector<16x128xi1>, vector<16x128xf32>
    %c0_18 = arith.constant 0 : index
    %c0_19 = arith.constant 0 : index
    %24 = vector.load %arg8[%c0_18, %c0_19] : memref<16x128xf32, #tpu.memory_space<vmem>>, vector<16x128xf32>
    tpu.vector_store %arg8[%c0_18, %c0_19], %23 {strides = array<i32>} : memref<16x128xf32, #tpu.memory_space<vmem>>, vector<16x128xf32>,
    return
  }
  func.func @transform_0(%arg0: i32) -> (i32, i32) {
    %c0_i32 = arith.constant 0 : i32
    %c0_i32_0 = arith.constant 0 : i32
    return %arg0, %c0_i32 : i32, i32
  }
  func.func @transform_1(%arg0: i32) -> (i32, i32) {
    %c0_i32 = arith.constant 0 : i32
    %c0_i32_0 = arith.constant 0 : i32
    return %arg0, %c0_i32 : i32, i32
  }
  func.func @transform_2(%arg0: i32) -> (i32, i32) {
    %c0_i32 = arith.constant 0 : i32
    %c0_i32_0 = arith.constant 0 : i32
    %c0_i32_1 = arith.constant 0 : i32
    return %c0_i32, %c0_i32_0 : i32, i32
  }
  func.func @transform_3(%arg0: i32) -> (i32, i32) {
    %c0_i32 = arith.constant 0 : i32
    %c0_i32_0 = arith.constant 0 : i32
    %c0_i32_1 = arith.constant 0 : i32
    return %c0_i32, %c0_i32_0 : i32, i32
  }
  func.func @transform_4(%arg0: i32) -> (i32, i32) {
    %c0_i32 = arith.constant 0 : i32
    %c0_i32_0 = arith.constant 0 : i32
    %c0_i32_1 = arith.constant 0 : i32
    return %c0_i32, %c0_i32_0 : i32, i32
  }
  func.func @transform_5(%arg0: i32) -> (i32, i32) {
    %c0_i32 = arith.constant 0 : i32
    %c0_i32_0 = arith.constant 0 : i32
    %c0_i32_1 = arith.constant 0 : i32
    return %c0_i32, %c0_i32_0 : i32, i32
  }
  func.func @transform_6(%arg0: i32) -> (i32, i32) {
    %c0_i32 = arith.constant 0 : i32
    %c0_i32_0 = arith.constant 0 : i32
    %c0_i32_1 = arith.constant 0 : i32
    return %c0_i32, %c0_i32_0 : i32, i32
  }
  func.func @transform_7(%arg0: i32) -> (i32, i32) {
    %c0_i32 = arith.constant 0 : i32
    %c0_i32_0 = arith.constant 0 : i32
    return %arg0, %c0_i32 : i32, i32
  }
}

</mosaic_0001>

<bundles_post_ra>
// kernel: meta_loss_net_forward.1
= control target key start
LH: loop header
LB: loop body
LE: loop exit
PB: predicated region body
PF: predicated region fallthrough
CT: control target
= control target key end

     0   :  { %12 = vsyncpa [#allocation3], 0  ;;  %s1019_s0 = inlined_call_operand.hbm [shape: f32[16,256], index: 0, kind: input, shape index: {}]   ;;  %s1020_s1 = inlined_call_operand.hbm [shape: f32[16,16], index: 1, kind: input, shape index: {}]   ;;  %s1021_s2 = inlined_call_operand.hbm [shape: f32[256,128], index: 2, kind: input, shape index: {}]   ;;  %s1022_s3 = inlined_call_operand.hbm [shape: f32[16,128], index: 3, kind: input, shape index: {}]   ;;  %s1023_s4 = inlined_call_operand.hbm [shape: f32[1,128], index: 4, kind: input, shape index: {}]   ;;  %s1024_s5 = inlined_call_operand.hbm [shape: f32[128,128], index: 5, kind: input, shape index: {}]   ;;  %s1025_s6 = inlined_call_operand.hbm [shape: f32[1,128], index: 6, kind: input, shape index: {}]   ;;  %s1026_s7 = inlined_call_operand.hbm [shape: f32[16,128], index: 7, kind: output, shape index: {}]  }
   0x1   :  { %13 = vsyncpa [#allocation6], 0 }
   0x2   :  { %14 = vsyncpa [#allocation9], 0 }
   0x3   :  { %15 = vsyncpa [#allocation12], 0 }
   0x4   :  { %16 = vsyncpa [#allocation4], 0  ;;  %s854_s24 = smov [#allocation5]   ;;  %s668_s28 = scalar_lea.hbm %s1020_s1, 256 }
   0x5   :  { %s34_s25 = sshll.u32 %s854_s24, 4  ;;  %p669_p0 = scmp.ne.s32.totalorder %s1020_s1, %s668_s28  ;;  %s35_s25 = int_to_ptr.vmem [resolvable:$true] %s34_s25 }
   0x6   :  { %p672_p1 = scmp.lt.u32.totalorder %s668_s28, %s1020_s1 }
   0x8   :  { %p674_p2 = pnand %p672_p1, %p669_p0 }
   0xa   :  { %677 = shalt.err (!%p674_p2)
}
   0xb   :  { %s678_s10 = scalar_lea.vmem %s35_s25, 256  ;;  %p683_p4 = scmp.lt.s32.totalorder %s35_s25, %s35_s25 }
   0xc   :  { %p679_p3 = scmp.ne.s32.totalorder %s35_s25, %s678_s10  ;;  %p684_p5 = scmp.lt.s32.totalorder %s678_s10, %s678_s10 }
   0xe   :  { %p685_p6 = por %p684_p5, %p683_p4 }
  0x10   :  { %p686_p7 = pnand %p685_p6, %p679_p3 }
  0x12   :  { %689 = shalt.err (!%p686_p7)
}
  0x13   :  { %s855_s11 = smov 128   ;;  %s856_s12 = smov 8  }
  0x14   :  { %40 = dma.hbm_to_vmem [thread:$0]  %s1020_s1, 256, %s35_s25, [#allocation6], %s855_s11, %s855_s11, %s856_s12  }
  0x15   :  { %s857_s15 = smov [#allocation8]   ;;  %s858_s17 = smov [#allocation11]  }
  0x16   :  { %s58_s16 = sshll.u32 %s857_s15, 4  ;;  %s80_s18 = sshll.u32 %s858_s17, 4  ;;  %s59_s16 = int_to_ptr.vmem [resolvable:$true] %s58_s16  ;;  %s81_s18 = int_to_ptr.vmem [resolvable:$true] %s80_s18 }
  0x17   :  { %s690_s21 = scalar_lea.hbm %s1022_s3, 256 }
  0x18   :  { %p691_p8 = scmp.ne.s32.totalorder %s1022_s3, %s690_s21  ;;  %p694_p9 = scmp.lt.u32.totalorder %s690_s21, %s1022_s3 }
  0x1a   :  { %p696_p10 = pnand %p694_p9, %p691_p8 }
  0x1c   :  { %699 = shalt.err (!%p696_p10)
}
  0x1d   :  { %s700_s1 = scalar_lea.vmem %s59_s16, 256  ;;  %p705_p12 = scmp.lt.s32.totalorder %s59_s16, %s59_s16 }
  0x1e   :  { %p701_p11 = scmp.ne.s32.totalorder %s59_s16, %s700_s1  ;;  %p706_p13 = scmp.lt.s32.totalorder %s700_s1, %s700_s1 }
  0x20   :  { %p707_p0 = por %p706_p13, %p705_p12 }
  0x22   :  { %p708_p1 = pnand %p707_p0, %p701_p11 }
  0x24   :  { %711 = shalt.err (!%p708_p1)
}
  0x25   :  { %64 = dma.hbm_to_vmem [thread:$0]  %s1022_s3, 256, %s59_s16, [#allocation9], %s855_s11, %s855_s11, %s856_s12  }
  0x26   :  { %s712_s30 = scalar_lea.hbm %s1024_s5, 2048 }
  0x27   :  { %p713_p2 = scmp.ne.s32.totalorder %s1024_s5, %s712_s30  ;;  %p716_p3 = scmp.lt.u32.totalorder %s712_s30, %s1024_s5 }
  0x29   :  { %p718_p4 = pnand %p716_p3, %p713_p2 }
  0x2b   :  { %721 = shalt.err (!%p718_p4)
}
  0x2c   :  { %s722_s14 = scalar_lea.vmem %s81_s18, 2048  ;;  %p727_p6 = scmp.lt.s32.totalorder %s81_s18, %s81_s18 }
  0x2d   :  { %p723_p5 = scmp.ne.s32.totalorder %s81_s18, %s722_s14  ;;  %p728_p7 = scmp.lt.s32.totalorder %s722_s14, %s722_s14 }
  0x2f   :  { %p729_p8 = por %p728_p7, %p727_p6 }
  0x31   :  { %p730_p9 = pnand %p729_p8, %p723_p5 }
  0x33   :  { %733 = shalt.err (!%p730_p9)
}
  0x34   :  { %86 = dma.hbm_to_vmem [thread:$0]  %s1024_s5, 2048, %s81_s18, [#allocation12], %s855_s11, %s855_s11, %s856_s12  }
  0x35   :  { %s859_s16 = smov [#allocation2]   ;;  %s734_s21 = scalar_lea.hbm %s1019_s0, 512 }
  0x36   :  { %s22_s17 = sshll.u32 %s859_s16, 4  ;;  %p735_p10 = scmp.ne.s32.totalorder %s1019_s0, %s734_s21  ;;  %s23_s17 = int_to_ptr.vmem [resolvable:$true] %s22_s17 }
  0x37   :  { %p738_p11 = scmp.lt.u32.totalorder %s734_s21, %s1019_s0 }
  0x39   :  { %p740_p12 = pnand %p738_p11, %p735_p10 }
  0x3b   :  { %743 = shalt.err (!%p740_p12)
}
  0x3c   :  { %s744_s1 = scalar_lea.vmem %s23_s17, 512  ;;  %p749_p0 = scmp.lt.s32.totalorder %s23_s17, %s23_s17 }
  0x3d   :  { %p745_p13 = scmp.ne.s32.totalorder %s23_s17, %s744_s1  ;;  %p750_p1 = scmp.lt.s32.totalorder %s744_s1, %s744_s1 }
  0x3f   :  { %p751_p2 = por %p750_p1, %p749_p0 }
  0x41   :  { %p752_p3 = pnand %p751_p2, %p745_p13 }
  0x43   :  { %755 = shalt.err (!%p752_p3)
}
  0x44   :  { %s860_s5 = smov 256   ;;  %s861_s18 = smov 16  }
  0x45   :  { %28 = dma.hbm_to_vmem [thread:$0]  %s1019_s0, 512, %s23_s17, [#allocation3], %s860_s5, %s860_s5, %s861_s18  }
  0x46   :  { %s862_s28 = smov [#allocation7]   ;;  %s863_s30 = smov [#allocation10]  }
  0x47   :  { %s46_s29 = sshll.u32 %s862_s28, 4  ;;  %s71_s8 = sshll.u32 %s863_s30, 4  ;;  %s47_s29 = int_to_ptr.vmem [resolvable:$true] %s46_s29  ;;  %s72_s8 = int_to_ptr.vmem [resolvable:$true] %s71_s8 }
  0x48   :  { %s756_s13 = scalar_lea.hbm %s1021_s2, 4096 }
  0x49   :  { %p757_p4 = scmp.ne.s32.totalorder %s1021_s2, %s756_s13  ;;  %p760_p5 = scmp.lt.u32.totalorder %s756_s13, %s1021_s2 }
  0x4b   :  { %p762_p6 = pnand %p760_p5, %p757_p4 }
  0x4d   :  { %765 = shalt.err (!%p762_p6)
}
  0x4e   :  { %s766_s0 = scalar_lea.vmem %s47_s29, 4096  ;;  %p771_p8 = scmp.lt.s32.totalorder %s47_s29, %s47_s29 }
  0x4f   :  { %p767_p7 = scmp.ne.s32.totalorder %s47_s29, %s766_s0  ;;  %p772_p9 = scmp.lt.s32.totalorder %s766_s0, %s766_s0 }
  0x51   :  { %p773_p10 = por %p772_p9, %p771_p8 }
  0x53   :  { %p774_p11 = pnand %p773_p10, %p767_p7 }
  0x55   :  { %777 = shalt.err (!%p774_p11)
}
  0x56   :  { %52 = dma.hbm_to_vmem [thread:$0]  %s1021_s2, 4096, %s47_s29, [#allocation6], %s855_s11, %s855_s11, %s856_s12  }
  0x57   :  { %s778_s22 = scalar_lea.hbm %s1023_s4, 16 }
  0x58   :  { %p779_p12 = scmp.ne.s32.totalorder %s1023_s4, %s778_s22  ;;  %p782_p13 = scmp.lt.u32.totalorder %s778_s22, %s1023_s4 }
  0x5a   :  { %p784_p0 = pnand %p782_p13, %p779_p12 }
  0x5c   :  { %787 = shalt.err (!%p784_p0)
}
  0x5d   :  { %s788_s5 = scalar_lea.vmem %s72_s8, 16  ;;  %s792_s18 = scalar_lea.vmem %s72_s8, 32 }
  0x5e   :  { %p789_p1 = scmp.ne.s32.totalorder %s72_s8, %s788_s5  ;;  %p793_p2 = scmp.lt.s32.totalorder %s72_s8, %s72_s8 }
  0x5f   :  { %p794_p3 = scmp.lt.s32.totalorder %s792_s18, %s788_s5 }
  0x61   :  { %p795_p4 = por %p794_p3, %p793_p2 }
  0x63   :  { %p796_p5 = pnand %p795_p4, %p789_p1 }
  0x65   :  { %799 = shalt.err (!%p796_p5)
}
  0x66   :  { %74 = dma.hbm_to_vmem [thread:$0]  %s1023_s4, 16, %s72_s8, [#allocation9]  }
  0x67   :  { %s864_s27 = smov [#allocation13]   ;;  %s800_s9 = scalar_lea.hbm %s1025_s6, 16 }
  0x68   :  { %s93_s28 = sshll.u32 %s864_s27, 4  ;;  %p801_p6 = scmp.ne.s32.totalorder %s1025_s6, %s800_s9  ;;  %s94_s28 = int_to_ptr.vmem [resolvable:$true] %s93_s28 }
  0x69   :  { %p804_p7 = scmp.lt.u32.totalorder %s800_s9, %s1025_s6 }
  0x6b   :  { %p806_p8 = pnand %p804_p7, %p801_p6 }
  0x6d   :  { %809 = shalt.err (!%p806_p8)
}
  0x6e   :  { %s810_s15 = scalar_lea.vmem %s94_s28, 16  ;;  %s814_s4 = scalar_lea.vmem %s94_s28, 32 }
  0x6f   :  { %p811_p9 = scmp.ne.s32.totalorder %s94_s28, %s810_s15  ;;  %p815_p10 = scmp.lt.s32.totalorder %s94_s28, %s94_s28 }
  0x70   :  { %p816_p11 = scmp.lt.s32.totalorder %s814_s4, %s810_s15 }
  0x72   :  { %p817_p12 = por %p816_p11, %p815_p10 }
  0x74   :  { %p818_p13 = pnand %p817_p12, %p811_p9 }
  0x76   :  { %821 = shalt.err (!%p818_p13)
}
  0x77   :  { %96 = dma.hbm_to_vmem [thread:$0]  %s1025_s6, 16, %s94_s28, [#allocation12]  }
  0x78   :  { %844 = dma.done.wait [#allocation3], 512  }
  0x79   :  { %845 = vsyncadd [#allocation3], 4294966784 }
  0x7a   :  { %846 = dma.done.wait [#allocation6], 4352  }
  0x7b   :  { %847 = vsyncadd [#allocation6], 4294962944 }
  0x7c   :  { %848 = dma.done.wait [#allocation9], 272  }
  0x7d   :  { %849 = vsyncadd [#allocation9], 4294967024 }
  0x7e   :  { %850 = dma.done.wait [#allocation12], 2064  }
  0x7f   :  { %851 = vsyncadd [#allocation12], 4294965232  ;;  %v138_v0 = vld [vmem:[#allocation7 + $0x80] sm:$0xff]  ;;  %v139_v1 = vld [vmem:[#allocation7 + $0x88] sm:$0xff]  ;;  %vm158_vm0 = vcmask 130048   ;;  %s865_s6 = smov [#allocation14]  }
  0x80   :  { %v122_v2 = vld [vmem:[#allocation7] sm:$0xff]  ;;  %v584_v3 = vpack.c.bf16 %v139_v1, %v138_v0  ;;  %v123_v4 = vld [vmem:[#allocation7 + $0x8] sm:$0xff]  ;;  %v140_v5 = vld [vmem:[#allocation7 + $0x90] sm:$0xff]  ;;  %s459_s0 = sshll.u32 %s865_s6, 4  ;;  %s460_s0 = int_to_ptr.vmem [resolvable:$true] %s459_s0 }
  0x81   :  { %v141_v6 = vld [vmem:[#allocation7 + $0x98] sm:$0xff]  ;;  %v586_v7 = vpack.c.bf16 %v123_v4, %v122_v2  ;;  %v124_v9 = vld [vmem:[#allocation7 + $0x10] sm:$0xff]  ;;  %v142_v11 = vld [vmem:[#allocation7 + $0xa0] sm:$0xff]  ;;  %s822_s17 = scalar_lea.vmem %s460_s0, 256  ;;  %p827_p1 = scmp.lt.s32.totalorder %s460_s0, %s460_s0 }
  0x82   :  { %v588_v8 = vpack.c.bf16 %v141_v6, %v140_v5  ;;  %v125_v10 = vld [vmem:[#allocation7 + $0x18] sm:$0xff]  ;;  %585 = vmatprep.subr.bf16.mxu1 %v584_v3  ;;  %v143_v12 = vld [vmem:[#allocation7 + $0xa8] sm:$0xff]  ;;  %v126_v15 = vld [vmem:[#allocation7 + $0x20] sm:$0xff]  ;;  %p823_p0 = scmp.ne.s32.totalorder %s460_s0, %s822_s17  ;;  %p828_p2 = scmp.lt.s32.totalorder %s822_s17, %s822_s17 }
  0x83   :  { %587 = vmatpush3.bf16.msra.mxu1 %v586_v7  ;;  %v590_v13 = vpack.c.bf16 %v125_v10, %v124_v9  ;;  %v592_v14 = vpack.c.bf16 %v143_v12, %v142_v11  ;;  %v127_v16 = vld [vmem:[#allocation7 + $0x28] sm:$0xff]  ;;  %v144_v17 = vld [vmem:[#allocation7 + $0xb0] sm:$0xff]  ;;  %v145_v18 = vld [vmem:[#allocation7 + $0xb8] sm:$0xff] }
  0x84   :  { %589 = vmatprep.subr.bf16.mxu1 %v588_v8  ;;  %v594_v19 = vpack.c.bf16 %v127_v16, %v126_v15  ;;  %v596_v20 = vpack.c.bf16 %v145_v18, %v144_v17  ;;  %v128_v21 = vld [vmem:[#allocation7 + $0x30] sm:$0xff]  ;;  %v129_v22 = vld [vmem:[#allocation7 + $0x38] sm:$0xff]  ;;  %v146_v23 = vld [vmem:[#allocation7 + $0xc0] sm:$0xff]  ;;  %p829_p3 = por %p828_p2, %p827_p1 }
  0x85   :  { %v147_v24 = vld [vmem:[#allocation7 + $0xc8] sm:$0xff]  ;;  %v156_v25 = vld [vmem:[#allocation8] sm:$0xff]  ;;  %v119_v27 = vld [vmem:[#allocation2 + $0x8] sm:$0xff]  ;;  %v598_v28 = vpack.c.bf16 %v129_v22, %v128_v21 }
  0x86   :  { %v157_v26 = vld [vmem:[#allocation8 + $0x8] sm:$0xff]  ;;  %v130_v29 = vld [vmem:[#allocation7 + $0x40] sm:$0xff]  ;;  %304 = vmatprep.mubr.f32.mxu1 %v119_v27  ;;  %v154_v32 = vld [vmem:[#allocation5] sm:$0xff]  ;;  %v600_v33 = vpack.c.bf16 %v147_v24, %v146_v23  ;;  %p830_p4 = pnand %p829_p3, %p823_p0 }
  0x87   :  { %591 = vmatpush3.bf16.msra.mxu1 %v590_v13  ;;  %v131_v30 = vld [vmem:[#allocation7 + $0x48] sm:$0xff]  ;;  %v580_v31 = vpack.c.bf16 %v157_v26, %v156_v25  ;;  %v148_v34 = vld [vmem:[#allocation7 + $0xd0] sm:$0xff]  ;;  %542 = vmatprep.mubr.msk.f32.mxu0 %vm158_vm0, %v154_v32  ;;  %v327_v36 = vld [vmem:[#allocation11 + $0x8] sm:$0xff] }
  0x88   :  { %593 = vmatprep.subr.bf16.mxu1 %v592_v14  ;;  %v326_v35 = vld [vmem:[#allocation11] sm:$0xff]  ;;  %v328_v39 = vld [vmem:[#allocation11 + $0x10] sm:$0xff]  ;;  %v329_v40 = vld [vmem:[#allocation11 + $0x18] sm:$0xff]  ;;  %v602_v42 = vpack.c.bf16 %v131_v30, %v130_v29 }
  0x89   :  { %v149_v37 = vld [vmem:[#allocation7 + $0xd8] sm:$0xff]  ;;  %581 = vmatprep.subr.bf16.mxu0 %v580_v31  ;;  %v616_v38 = vpack.c.bf16 %v327_v36, %v326_v35  ;;  %v132_v43 = vld [vmem:[#allocation7 + $0x50] sm:$0xff]  ;;  %v620_v44 = vpack.c.bf16 %v329_v40, %v328_v39  ;;  %v150_v49 = vld [vmem:[#allocation7 + $0xe0] sm:$0xff] }
  0x8a   :  { %583 = vmatpush3.bf16.msra.mxu0 %v580_v31  ;;  %v155_v41 = vld [vmem:[#allocation5 + $0x8] sm:$0xff]  ;;  %v604_v45 = vpack.c.bf16 %v149_v37, %v148_v34  ;;  %v151_v50 = vld [vmem:[#allocation7 + $0xe8] sm:$0xff]  ;;  %v134_v52 = vld [vmem:[#allocation7 + $0x60] sm:$0xff] }
  0x8b   :  { %595 = vmatpush3.bf16.msra.mxu1 %v594_v19  ;;  %617 = vmatprep.subr.bf16.mxu0 %v616_v38  ;;  %v133_v46 = vld [vmem:[#allocation7 + $0x58] sm:$0xff]  ;;  %v608_v54 = vpack.c.bf16 %v151_v50, %v150_v49  ;;  %v135_v55 = vld [vmem:[#allocation7 + $0x68] sm:$0xff]  ;;  %v152_v58 = vld [vmem:[#allocation7 + $0xf0] sm:$0xff] }
  0x8c   :  { %597 = vmatprep.subr.bf16.mxu1 %v596_v20  ;;  %v330_v47 = vld [vmem:[#allocation11 + $0x20] sm:$0xff]  ;;  %v331_v48 = vld [vmem:[#allocation11 + $0x28] sm:$0xff]  ;;  %v606_v51 = vpack.c.bf16 %v133_v46, %v132_v43  ;;  %v332_v56 = vld [vmem:[#allocation11 + $0x30] sm:$0xff]  ;;  %v610_v60 = vpack.c.bf16 %v135_v55, %v134_v52 }
  0x8d   :  { %543 = vmatmul.mubr.msk.f32.vlgmr.msra.gmra.mrb[0].mxu0 %vm158_vm0, %v155_v41  ;;  %v624_v53 = vpack.c.bf16 %v331_v48, %v330_v47  ;;  %v333_v57 = vld [vmem:[#allocation11 + $0x38] sm:$0xff]  ;;  %v153_v59 = vld [vmem:[#allocation7 + $0xf8] sm:$0xff]  ;;  %v120_v7 = vld [vmem:[#allocation2 + $0x10] sm:$0xff] }
  0x8e   :  { %619 = vmatpush3.bf16.msra.mxu0 %v616_v38  ;;  %v136_v61 = vld [vmem:[#allocation7 + $0x70] sm:$0xff]  ;;  %v628_v62 = vpack.c.bf16 %v333_v57, %v332_v56  ;;  %v612_v63 = vpack.c.bf16 %v153_v59, %v152_v58  ;;  %v137_v0 = vld [vmem:[#allocation7 + $0x78] sm:$0xff]  ;;  %v121_v6 = vld [vmem:[#allocation2 + $0x18] sm:$0xff] }
  0x8f   :  { %599 = vmatpush3.bf16.msra.mxu1 %v598_v28  ;;  %621 = vmatprep.subr.bf16.mxu0 %v620_v44  ;;  %v334_v1 = vld [vmem:[#allocation11 + $0x40] sm:$0xff]  ;;  %v335_v2 = vld [vmem:[#allocation11 + $0x48] sm:$0xff]  ;;  %v614_v3 = vpack.c.bf16 %v137_v0, %v136_v61  ;;  %v336_v8 = vld [vmem:[#allocation11 + $0x50] sm:$0xff] }
  0x90   :  { %601 = vmatprep.subr.bf16.mxu1 %v600_v33  ;;  %v632_v4 = vpack.c.bf16 %v335_v2, %v334_v1  ;;  %v118_v5 = vld [vmem:[#allocation2] sm:$0xff]  ;;  %v339_v12 = vld [vmem:[#allocation11 + $0x68] sm:$0xff]  ;;  %v340_v14 = vld [vmem:[#allocation11 + $0x70] sm:$0xff] }
  0x91   :  { %v337_v9 = vld [vmem:[#allocation11 + $0x58] sm:$0xff]  ;;  %v338_v11 = vld [vmem:[#allocation11 + $0x60] sm:$0xff] }
  0x92   :  { %623 = vmatpush3.bf16.msra.mxu0 %v620_v44  ;;  %v636_v10 = vpack.c.bf16 %v337_v9, %v336_v8  ;;  %v640_v13 = vpack.c.bf16 %v339_v12, %v338_v11  ;;  %v341_v15 = vld [vmem:[#allocation11 + $0x78] sm:$0xff]  ;;  %v477_v32 = vld [vmem:[#allocation13] ss:$0 sm:$0xff] }
  0x93   :  { %603 = vmatpush3.bf16.msra.mxu1 %v602_v42  ;;  %625 = vmatprep.subr.bf16.mxu0 %v624_v53  ;;  %v644_v16 = vpack.c.bf16 %v341_v15, %v340_v14  ;;  %v476_v22 = vld [vmem:[#allocation10] ss:$0 sm:$0xff] }
  0x94   :  { %605 = vmatprep.subr.bf16.mxu1 %v604_v45 }
  0x96   :  { %627 = vmatpush3.bf16.msra.mxu0 %v624_v53 }
  0x97   :  { %607 = vmatpush3.bf16.msra.mxu1 %v606_v51  ;;  %629 = vmatprep.subr.bf16.mxu0 %v628_v62 }
  0x98   :  { %609 = vmatprep.subr.bf16.mxu1 %v608_v54 }
  0x9a   :  { %631 = vmatpush3.bf16.msra.mxu0 %v628_v62 }
  0x9b   :  { %611 = vmatpush3.bf16.msra.mxu1 %v610_v60  ;;  %633 = vmatprep.subr.bf16.mxu0 %v632_v4 }
  0x9c   :  { %613 = vmatprep.subr.bf16.mxu1 %v612_v63 }
  0x9e   :  { %635 = vmatpush3.bf16.msra.mxu0 %v632_v4 }
  0x9f   :  { %615 = vmatpush3.bf16.msra.mxu1 %v614_v3  ;;  %637 = vmatprep.subr.bf16.mxu0 %v636_v10 }
  0xa2   :  { %305 = vmatmul.mubr.f32.vlgmr.msra.gmra.mrb[0].mxu1 %v118_v5  ;;  %639 = vmatpush3.bf16.msra.mxu0 %v636_v10 }
  0xa3   :  { %309 = vmatprep.mubr.f32.mxu1 %v121_v6  ;;  %641 = vmatprep.subr.bf16.mxu0 %v640_v13 }
  0xa6   :  { %310 = vmatmul.mubr.f32.gmra.mrb[2].mxu1 %v120_v7  ;;  %643 = vmatpush3.bf16.msra.mxu0 %v640_v13 }
  0xa7   :  { %645 = vmatprep.subr.bf16.mxu0 %v644_v16 }
  0xaa   :  { %647 = vmatpush3.bf16.msra.mxu0 %v644_v16 }
 0x160   :  { %v544_v17 = vpop.f32.mrb[0].mxu0 }
 0x161   :  { %v231_v18 = vpop.f32.mrb[1].mxu0 }
 0x175   :  { %v514_v19 = vpop.f32.mrb[0].mxu1 }
 0x176   :  { %v515_v20 = vpop.f32.mrb[1].mxu1 }
 0x177   :  { %v516_v21 = vadd.f32 %v515_v20, %v514_v19 }
 0x179   :  { %v307_v23 = vadd.f32 %v516_v21, %v231_v18  ;;  %v517_v24 = vpop.f32.mrb[2].mxu1 }
 0x17a   :  { %v518_v25 = vpop.f32.mrb[3].mxu1 }
 0x17b   :  { %v322_v26 = vadd.f32 %v476_v22, %v307_v23  ;;  %v519_v27 = vadd.f32 %v518_v25, %v517_v24 }
 0x17d   :  { %v324_v28 = vmax.f32 %v322_v26, 0.0  ;;  %v312_v29 = vadd.f32 %v544_v17, %v519_v27 }
 0x17f   :  { %v323_v30 = vadd.f32 %v476_v22, %v312_v29  ;;  %577 = vmatprep.mubr.f32.mxu0 %v324_v28 }
 0x181   :  { %v325_v31 = vmax.f32 %v323_v30, 0.0 }
 0x183   :  { %578 = vmatmul.mubr.f32.vlgmr.msra.gmra.mrb[2].mxu0 %v325_v31 }
 0x256   :  { %v579_v33 = vpop.f32.mrb[2].mxu0 }
 0x257   :  { %v421_v34 = vadd.f32 %v579_v33, %v477_v32  ;;  %v415_v35 = vpop.f32.mrb[3].mxu0 }
 0x258   :  { %v416_v36 = vadd.f32 %v477_v32, %v415_v35 }
 0x259   :  { %v425_v37 = vmin.f32 %v421_v34, 20.0  ;;  %vm427_vm2 = vcmp.gt.f32.partialorder %v421_v34, 20.0 }
 0x25a   :  { %v424_v38 = vmin.f32 %v416_v36, 20.0  ;;  %vm426_vm4 = vcmp.gt.f32.partialorder %v416_v36, 20.0 }
 0x25b   :  { %v430_v39 = vmul.f32 1.442695, %v425_v37 }
 0x25c   :  { %v428_v40 = vmul.f32 1.442695, %v424_v38 }
 0x25d   :  { %660 = vpow2.f32 %v430_v39 }
 0x25e   :  { %662 = vpow2.f32 %v428_v40 }
 0x267   :  { %v661_v41 = vpop.eup %660 }
 0x268   :  { %v663_v42 = vpop.eup %662  ;;  %v441_v43 = vadd.f32 1.0, %v661_v41  ;;  %v444_v45 = vmul.f32 -0.5, %v661_v41  ;;  %v447_v49 = vand.u32 2147483647, %v661_v41 }
 0x269   :  { %v432_v44 = vadd.f32 1.0, %v663_v42  ;;  %v435_v46 = vmul.f32 -0.5, %v663_v42  ;;  %v438_v50 = vand.u32 2147483647, %v663_v42 }
 0x26a   :  { %664 = vlog2.f32 %v441_v43  ;;  %v445_v47 = vadd.f32 1.0, %v444_v45  ;;  %vm448_vm1 = vcmp.lt.f32.partialorder %v447_v49, 0.0004427343 }
 0x26b   :  { %666 = vlog2.f32 %v432_v44  ;;  %v436_v48 = vadd.f32 1.0, %v435_v46  ;;  %vm439_vm3 = vcmp.lt.f32.partialorder %v438_v50, 0.0004427343 }
 0x26c   :  { %v446_v54 = vmul.f32 %v661_v41, %v445_v47 }
 0x26d   :  { %v437_v56 = vmul.f32 %v663_v42, %v436_v48 }
 0x274   :  { %v665_v51 = vpop.eup %664 }
 0x275   :  { %v667_v52 = vpop.eup %666  ;;  %v443_v53 = vmul.f32 0.6931472, %v665_v51 }
 0x276   :  { %v434_v55 = vmul.f32 0.6931472, %v667_v52 }
 0x277   :  { %v449_v57 = vsel %vm448_vm1, %v446_v54, %v443_v53 }
 0x278   :  { %v440_v58 = vsel %vm439_vm3, %v437_v56, %v434_v55  ;;  %v451_v59 = vsel %vm427_vm2, %v421_v34, %v449_v57 }
 0x279   :  { %v450_v60 = vsel %vm426_vm4, %v416_v36, %v440_v58  ;;  %453 = vst [vmem:[#allocation14 + $0x8] sm:$0xff] %v451_v59 }
 0x27a   :  { %452 = vst [vmem:[#allocation14] sm:$0xff] %v450_v60 }
 0x27b   :  { %833 = shalt.err (!%p830_p4)
}
 0x27c   :  { %s834_s21 = scalar_lea.hbm %s1026_s7, 256 }
 0x27d   :  { %p835_p5 = scmp.ne.s32.totalorder %s1026_s7, %s834_s21  ;;  %p838_p6 = scmp.lt.u32.totalorder %s834_s21, %s1026_s7 }
 0x27f   :  { %p840_p7 = pnand %p838_p6, %p835_p5 }
 0x281   :  { %843 = shalt.err (!%p840_p7)
}
 0x282   :  { %465 = dma.vmem_to_hbm [thread:$0]  %s460_s0, 256, %s1026_s7, [#allocation4], %s855_s11, %s855_s11, %s856_s12  }
 0x283   :  { %852 = dma.done.wait [#allocation4], 256  }
 0x284   :  { %853 = vsyncadd [#allocation4], 4294967040 }
 0x285   :  { %469 = vsyncpa [#allocation3], 1 }
 0x286   :  { %470 = vsyncpa [#allocation6], 1 }
 0x287   :  { %471 = vsyncpa [#allocation9], 1 }
 0x288   :  { %472 = vsyncpa [#allocation12], 1 }
 0x289   :  { %473 = vsyncpa [#allocation4], 1 }

</bundles_post_ra>
